<compile_context>
chip_gen: v7x
topology: tpu7x:2x2x1
jax: 0.10.0
libtpu: 0.0.40
codegen_flags: <defaults>
</compile_context>

<pallas_src>
import jax
import jax.numpy as jnp
from jax.experimental import pallas as pl
from jax.experimental.pallas import tpu as pltpu


def entity_emb_gather_kernel(ids_ref, table_ref, out_ref):
    """Pure gather: out[t, :] = folded_table[ids[t], :] via exact one-hot matmul."""
    ids = ids_ref[...]                                      # (TB, 1) int32
    tb = ids.shape[0]
    e_pad = table_ref.shape[0]

    iota_e = jax.lax.broadcasted_iota(jnp.int32, (tb, e_pad), 1)
    onehot = (iota_e == ids).astype(table_ref.dtype)        # exact 0.0 / 1.0
    gathered = jnp.dot(onehot, table_ref[...],
                       preferred_element_type=jnp.float32)  # (TB, H), MXU
    out_ref[...] = gathered.astype(out_ref.dtype)


def _round_up(x, m):
    return ((x + m - 1) // m) * m


def _tpu_generation_defaults():
    """(default token_block, minimum grid steps) for the attached TPU generation."""
    kind = ""
    try:
        kind = jax.devices()[0].device_kind.lower()
    except Exception:  # e.g. no devices yet / non-TPU backend
        pass
    if "v7" in kind:
        # 2 TensorCores per chip, 3.2 TB/s HBM, 64 MiB VMEM (not a constraint
        # here: even tb=4096 f32 is ~6 MiB of buffers): big tiles, >=2 steps
        # so both TCs get balanced work.
        return 4096, 2
    # v5e / v6e: 1 TensorCore, no reason to force a >=2-step grid.
    return 2048, 1


def _fold_table(table, common, gamma, beta, eps):
    """Fold (+common) + LayerNorm + affine into the (E, H) table (f32)."""
    E, H = table.shape
    tbl = table.astype(jnp.float32)
    if common is not None:
        tbl = tbl + common.reshape(1, H).astype(jnp.float32)
    mean = jnp.mean(tbl, axis=-1, keepdims=True)
    xc = tbl - mean
    var = jnp.mean(xc * xc, axis=-1, keepdims=True)
    folded = xc * jax.lax.rsqrt(var + eps)
    folded = (folded * gamma.reshape(1, H).astype(jnp.float32)
              + beta.reshape(1, H).astype(jnp.float32))
    return folded


def entity_embeddings_forward(input_ids, table, common, gamma, beta, *,
                              eps=1e-12,
                              token_block=None,
                              out_dtype=jnp.float32,
                              mxu_dtype=jnp.float32,
                              min_pallas_tokens=2048):
    """input_ids: (B, S) int; table: (E, H); common: (H,) or None; gamma/beta: (H,).

    out_dtype=bf16 halves the output HBM traffic (the dominant cost) when the
    consumer tolerates it; mxu_dtype=bf16 gives a single-pass MXU and a smaller
    table DMA at the cost of bf16 rounding of the stored table values.
    Defaults keep f32 end-to-end for exact parity with the PyTorch module.
    """
    B, S = input_ids.shape
    T = B * S
    E, H = table.shape

    # ---- Fold (+common) + LayerNorm + affine into the tiny table once ------
    # The module output depends only on the token id, so per-token VPU/XLU/EUP
    # work would be redundant by a factor of T/E; do it on E rows in plain XLA.
    folded = _fold_table(table, common, gamma, beta, eps)

    # Clamp ids defensively (nn.Embedding would error on OOB; a silent zero row
    # from an all-zero one-hot is worse than a clamped lookup).
    ids = jnp.clip(input_ids.reshape(T).astype(jnp.int32), 0, E - 1)

    # ---- Small-T fast path: fixed pallas_call cost dwarfs the work ----------
    if T < min_pallas_tokens:
        out = jnp.take(folded, ids, axis=0).astype(out_dtype)
        return out.reshape(B, S, H)

    # ---- Pad K (entity axis) to a full 128-lane MXU contraction -------------
    e_pad = _round_up(E, 128)
    if e_pad != E:
        folded = jnp.pad(folded, ((0, e_pad - E), (0, 0)))
    folded = folded.astype(mxu_dtype)

    # ---- Generation-aware tile-size selection --------------------------------
    # Balance the grid: steps = max(min_steps, ceil(T / token_block)), then size
    # tb to cover T in exactly that many steps.  Keeps padding waste < 1 row
    # group and avoids splitting tiny workloads on single-TC chips.
    default_tb, min_steps = _tpu_generation_defaults()
    if token_block is None:
        token_block = default_tb
    steps = max(min_steps, pl.cdiv(T, token_block))
    tb = max(8, _round_up(pl.cdiv(T, steps), 8))
    t_pad = _round_up(T, tb)
    grid = (t_pad // tb,)

    if t_pad != T:
        ids = jnp.pad(ids, (0, t_pad - T))          # pad with id 0; sliced off below
    ids2d = ids.reshape(t_pad, 1)

    out_bytes = jnp.dtype(out_dtype).itemsize
    tbl_bytes = jnp.dtype(mxu_dtype).itemsize
    cost = pl.CostEstimate(
        flops=2 * t_pad * e_pad * H,
        transcendentals=0,
        bytes_accessed=t_pad * 4 + t_pad * H * out_bytes + e_pad * H * tbl_bytes,
    )

    out = pl.pallas_call(
        entity_emb_gather_kernel,
        out_shape=jax.ShapeDtypeStruct((t_pad, H), out_dtype),
        grid_spec=pltpu.PrefetchScalarGridSpec(
            num_scalar_prefetch=0,
            grid=grid,
            in_specs=[
                pl.BlockSpec((tb, 1), lambda i: (i, 0)),        # token ids
                pl.BlockSpec((e_pad, H), lambda i: (0, 0)),     # folded table (tiny)
            ],
            out_specs=pl.BlockSpec((tb, H), lambda i: (i, 0)),  # lane-dense output
        ),
        compiler_params=pltpu.CompilerParams(
            dimension_semantics=("parallel",)),
        cost_estimate=cost,
    )(ids2d, folded)

    return out[:T].reshape(B, S, H)


def _reference(input_ids, table, common, gamma, beta, eps):
    ref = table[input_ids]
    if common is not None:
        ref = ref + common[None, None, :]
    mu = ref.mean(-1, keepdims=True)
    var = ((ref - mu) ** 2).mean(-1, keepdims=True)
    return (ref - mu) * jax.lax.rsqrt(var + eps) * gamma + beta


if __name__ == "__main__":
    # config: entity_queries_num=16, hidden_size=128, layer_norm_eps=1e-12,
    #         use_entity_common_embedding=True, is_pos_embedding=False
    ENTITY_QUERIES_NUM = 16
    HIDDEN = 128
    EPS = 1e-12

    key = jax.random.PRNGKey(0)
    k_ids, k_tab, k_common, k_ids2 = jax.random.split(key, 4)

    # nn.Embedding default init: N(0, 1); LayerNorm: gamma=1, beta=0.
    table = jax.random.normal(k_tab, (ENTITY_QUERIES_NUM, HIDDEN), jnp.float32)
    common = jax.random.normal(k_common, (HIDDEN,), jnp.float32)
    gamma = jnp.ones((HIDDEN,), jnp.float32)
    beta = jnp.zeros((HIDDEN,), jnp.float32)

    # --- Small demo shape (B=2, S=8), forcing the Pallas path -----------------
    B, S = 2, 8
    input_ids = jax.random.randint(k_ids, (B, S), 0, ENTITY_QUERIES_NUM,
                                   dtype=jnp.int32)
    out = entity_embeddings_forward(input_ids, table, common, gamma, beta,
                                    eps=EPS, min_pallas_tokens=0)
    out = jax.block_until_ready(out)
    ref = _reference(input_ids, table, common, gamma, beta, EPS)
    assert out.shape == (B, S, HIDDEN)
    assert jnp.allclose(out, ref, atol=1e-5, rtol=1e-5)

    # Default small-T fast path (XLA gather on the folded table) also matches.
    out_fast = entity_embeddings_forward(input_ids, table, common, gamma, beta,
                                         eps=EPS)
    assert jnp.allclose(jax.block_until_ready(out_fast), ref,
                        atol=1e-5, rtol=1e-5)

    # --- Slightly larger shape to exercise a multi-step grid + tail padding ---
    B2, S2 = 4, 640   # T = 2560 -> 2 grid steps on v5e/v6e, balanced tiles
    input_ids2 = jax.random.randint(k_ids2, (B2, S2), 0, ENTITY_QUERIES_NUM,
                                    dtype=jnp.int32)
    out2 = entity_embeddings_forward(input_ids2, table, common, gamma, beta,
                                     eps=EPS, min_pallas_tokens=0)
    out2 = jax.block_until_ready(out2)
    ref2 = _reference(input_ids2, table, common, gamma, beta, EPS)
    assert out2.shape == (B2, S2, HIDDEN)
    assert jnp.allclose(out2, ref2, atol=1e-5, rtol=1e-5)

    print("KERNEL_OK")
</pallas_src>

<mosaic_0001>
module attributes {stable_mosaic.version = 11 : i64} {
  func.func @entity_emb_gather_kernel(%arg0: i32, %arg1: memref<16x1xi32, #tpu.memory_space<vmem>>, %arg2: memref<128x128xf32, #tpu.memory_space<vmem>>, %arg3: memref<16x128xf32, #tpu.memory_space<vmem>>) attributes {dimension_semantics = [#tpu.dimension_semantics<parallel>], iteration_bounds = array<i64: 1>, scalar_prefetch = 0 : i64, scratch_operands = 0 : i64, tpu.core_type = #tpu.core_type<tc>, window_params = [{transform_indices = @transform_0, window_bounds = array<i64: 16, 1>}, {pipeline_mode = #tpu.pipeline_mode<synchronous>, transform_indices = @transform_1, window_bounds = array<i64: 128, 128>}, {transform_indices = @transform_2, window_bounds = array<i64: 16, 128>}]} {
    %c0 = arith.constant 0 : index
    %c0_0 = arith.constant 0 : index
    %0 = vector.load %arg1[%c0, %c0_0] : memref<16x1xi32, #tpu.memory_space<vmem>>, vector<16x1xi32>
    %1 = tpu.iota {dimensions = array<i32: 1>} : vector<16x128xi32>
    %2 = vector.broadcast %0 : vector<16x1xi32> to vector<16x128xi32>
    %3 = arith.cmpi eq, %1, %2 : vector<16x128xi32>
    %4 = arith.extui %3 : vector<16x128xi1> to vector<16x128xi32>
    %5 = arith.sitofp %4 : vector<16x128xi32> to vector<16x128xf32>
    %c0_1 = arith.constant 0 : index
    %c0_2 = arith.constant 0 : index
    %6 = vector.load %arg2[%c0_1, %c0_2] : memref<128x128xf32, #tpu.memory_space<vmem>>, vector<128x128xf32>
    %cst = arith.constant dense<0.000000e+00> : vector<16x128xf32>
    %7 = tpu.matmul %5, %6, %cst {dimension_numbers = #tpu.dot_dimension_numbers<[1], [0], [0], [1], [0, 0, 1, 1], [], []>} : vector<16x128xf32>, vector<128x128xf32>, vector<16x128xf32> -> vector<16x128xf32>
    %c0_3 = arith.constant 0 : index
    %c0_4 = arith.constant 0 : index
    %8 = vector.load %arg3[%c0_3, %c0_4] : memref<16x128xf32, #tpu.memory_space<vmem>>, vector<16x128xf32>
    tpu.vector_store %arg3[%c0_3, %c0_4], %7 {strides = array<i32>} : memref<16x128xf32, #tpu.memory_space<vmem>>, vector<16x128xf32>,
    return
  }
  func.func @transform_0(%arg0: i32) -> (i32, i32) {
    %c0_i32 = arith.constant 0 : i32
    %c0_i32_0 = arith.constant 0 : i32
    return %arg0, %c0_i32 : i32, i32
  }
  func.func @transform_1(%arg0: i32) -> (i32, i32) {
    %c0_i32 = arith.constant 0 : i32
    %c0_i32_0 = arith.constant 0 : i32
    %c0_i32_1 = arith.constant 0 : i32
    return %c0_i32, %c0_i32_0 : i32, i32
  }
  func.func @transform_2(%arg0: i32) -> (i32, i32) {
    %c0_i32 = arith.constant 0 : i32
    %c0_i32_0 = arith.constant 0 : i32
    return %arg0, %c0_i32 : i32, i32
  }
}

</mosaic_0001>

<bundles_post_ra>
// kernel: tpu_custom_call.1
= control target key start
LH: loop header
LB: loop body
LE: loop exit
PB: predicated region body
PF: predicated region fallthrough
CT: control target
= control target key end

     0   :  { %7 = vsyncpa [#allocation3], 0  ;;  %s353_s0 = inlined_call_operand.vmem [shape: s32[16,1], index: 0, kind: input, shape index: {}]   ;;  %s354_s1 = inlined_call_operand.hbm [shape: f32[128,128], index: 1, kind: input, shape index: {}]   ;;  %s355_s2 = inlined_call_operand.hbm [shape: f32[16,128], index: 2, kind: output, shape index: {}]  }
   0x1   :  { %8 = vsyncpa [#allocation4], 0  ;;  %s296_s9 = smov [#allocation2]   ;;  %s248_s13 = scalar_lea.hbm %s354_s1, 2048 }
   0x2   :  { %s16_s10 = sshll.u32 %s296_s9, 4  ;;  %p249_p0 = scmp.ne.s32.totalorder %s354_s1, %s248_s13  ;;  %s17_s10 = int_to_ptr.vmem [resolvable:$true] %s16_s10 }
   0x3   :  { %p252_p1 = scmp.lt.u32.totalorder %s248_s13, %s354_s1 }
   0x5   :  { %p254_p2 = pnand %p252_p1, %p249_p0 }
   0x7   :  { %257 = shalt.err (!%p254_p2)
}
   0x8   :  { %s258_s18 = scalar_lea.vmem %s17_s10, 2048  ;;  %p263_p4 = scmp.lt.s32.totalorder %s17_s10, %s17_s10 }
   0x9   :  { %p259_p3 = scmp.ne.s32.totalorder %s17_s10, %s258_s18  ;;  %p264_p5 = scmp.lt.s32.totalorder %s258_s18, %s258_s18 }
   0xb   :  { %p265_p6 = por %p264_p5, %p263_p4 }
   0xd   :  { %p266_p7 = pnand %p265_p6, %p259_p3 }
   0xf   :  { %269 = shalt.err (!%p266_p7)
}
  0x10   :  { %s297_s19 = smov 128   ;;  %s298_s20 = smov 8  }
  0x11   :  { %22 = dma.hbm_to_vmem [thread:$0]  %s354_s1, 2048, %s17_s10, [#allocation3], %s297_s19, %s297_s19, %s298_s20  }
  0x12   :  { %292 = dma.done.wait [#allocation3], 2048  }
  0x13   :  { %293 = vsyncadd [#allocation3], 4294965248  ;;  %v299_v0 = vmov 0   ;;  %v26_v1 = vld [vmem:[%s353_s0] sm:$0xff]  ;;  %v43_v3 = vld [vmem:[#allocation2 + $0x8] sm:$0xff]  ;;  %v28_v27 = vlaneseq  ;;  %v300_v30 = vmov 1.0  }
  0x14   :  { %247 = vset.pattern.permute.xlu0 %v299_v0  ;;  %v42_v2 = vld [vmem:[#allocation2] sm:$0xff]  ;;  %v44_v4 = vld [vmem:[#allocation2 + $0x10] sm:$0xff]  ;;  %v45_v5 = vld [vmem:[#allocation2 + $0x18] sm:$0xff] }
  0x15   :  { %31 = vperm.xlu0 %247, %v26_v1   ;;  %v27_v6 = vld [vmem:[%s353_s0 + $0x8] sm:$0xff]  ;;  %v209_v7 = vpack.c.bf16 %v43_v3, %v42_v2  ;;  %v213_v8 = vpack.c.bf16 %v45_v5, %v44_v4  ;;  %v46_v9 = vld [vmem:[#allocation2 + $0x20] sm:$0xff]  ;;  %v48_v12 = vld [vmem:[#allocation2 + $0x30] sm:$0xff]  ;;  %v29_v28 = vand.u32 127, %v28_v27  ;;  %s301_s0 = smov [#allocation5]  }
  0x16   :  { %v47_v10 = vld [vmem:[#allocation2 + $0x28] sm:$0xff]  ;;  %v49_v13 = vld [vmem:[#allocation2 + $0x38] sm:$0xff]  ;;  %v50_v15 = vld [vmem:[#allocation2 + $0x40] sm:$0xff]  ;;  %s140_s1 = sshll.u32 %s301_s0, 4  ;;  %s141_s1 = int_to_ptr.vmem [resolvable:$true] %s140_s1 }
  0x17   :  { %210 = vmatprep.subr.bf16.mxu0 %v209_v7  ;;  %v217_v11 = vpack.c.bf16 %v47_v10, %v46_v9  ;;  %v221_v14 = vpack.c.bf16 %v49_v13, %v48_v12  ;;  %v51_v16 = vld [vmem:[#allocation2 + $0x48] sm:$0xff]  ;;  %v52_v18 = vld [vmem:[#allocation2 + $0x50] sm:$0xff]  ;;  %v53_v19 = vld [vmem:[#allocation2 + $0x58] sm:$0xff]  ;;  %s270_s27 = scalar_lea.vmem %s141_s1, 256  ;;  %p275_p9 = scmp.lt.s32.totalorder %s141_s1, %s141_s1 }
  0x18   :  { %212 = vmatpush3.bf16.msra.mxu0 %v209_v7  ;;  %v225_v17 = vpack.c.bf16 %v51_v16, %v50_v15  ;;  %v229_v20 = vpack.c.bf16 %v53_v19, %v52_v18  ;;  %v54_v21 = vld [vmem:[#allocation2 + $0x60] sm:$0xff]  ;;  %v55_v22 = vld [vmem:[#allocation2 + $0x68] sm:$0xff]  ;;  %v56_v24 = vld [vmem:[#allocation2 + $0x70] sm:$0xff]  ;;  %p271_p8 = scmp.ne.s32.totalorder %s141_s1, %s270_s27  ;;  %p276_p10 = scmp.lt.s32.totalorder %s270_s27, %s270_s27 }
  0x19   :  { %34 = vperm.xlu0 %247, %v27_v6   ;;  %214 = vmatprep.subr.bf16.mxu0 %v213_v8  ;;  %v233_v23 = vpack.c.bf16 %v55_v22, %v54_v21  ;;  %v57_v25 = vld [vmem:[#allocation2 + $0x78] sm:$0xff] }
  0x1a   :  { %v237_v26 = vpack.c.bf16 %v57_v25, %v56_v24  ;;  %p277_p11 = por %p276_p10, %p275_p9 }
  0x1c   :  { %216 = vmatpush3.bf16.msra.mxu0 %v213_v8  ;;  %p278_p12 = pnand %p277_p11, %p271_p8 }
  0x1d   :  { %218 = vmatprep.subr.bf16.mxu0 %v217_v11 }
  0x20   :  { %220 = vmatpush3.bf16.msra.mxu0 %v217_v11 }
  0x21   :  { %222 = vmatprep.subr.bf16.mxu0 %v221_v14 }
  0x24   :  { %224 = vmatpush3.bf16.msra.mxu0 %v221_v14 }
  0x25   :  { %226 = vmatprep.subr.bf16.mxu0 %v225_v17 }
  0x28   :  { %228 = vmatpush3.bf16.msra.mxu0 %v225_v17 }
  0x29   :  { %230 = vmatprep.subr.bf16.mxu0 %v229_v20 }
  0x2c   :  { %232 = vmatpush3.bf16.msra.mxu0 %v229_v20 }
  0x2d   :  { %234 = vmatprep.subr.bf16.mxu0 %v233_v23 }
  0x30   :  { %236 = vmatpush3.bf16.msra.mxu0 %v233_v23 }
  0x31   :  { %238 = vmatprep.subr.bf16.mxu0 %v237_v26 }
  0x34   :  { %240 = vmatpush3.bf16.msra.mxu0 %v237_v26 }
  0x94   :  { %v32_v29 = vpop.permute.xlu0 %31 }
  0x95   :  { %vm36_vm0 = vcmp.eq.s32.totalorder %v29_v28, %v32_v29 }
  0x96   :  { %206 = vmatprep.mubr.msk.f32.mxu0 %vm36_vm0, %v300_v30 }
  0x98   :  { %v35_v31 = vpop.permute.xlu0 %34 }
  0x99   :  { %vm37_vm1 = vcmp.eq.s32.totalorder %v29_v28, %v35_v31 }
  0x9a   :  { %207 = vmatmul.mubr.msk.f32.vlgmr.msra.gmra.mrb[0].mxu0 %vm37_vm1, %v300_v30 }
 0x16d   :  { %v208_v32 = vpop.f32.mrb[0].mxu0 }
 0x16e   :  { %134 = vst [vmem:[#allocation5 + $0x8] sm:$0xff] %v208_v32  ;;  %v124_v33 = vpop.f32.mrb[1].mxu0 }
 0x16f   :  { %133 = vst [vmem:[#allocation5] sm:$0xff] %v124_v33 }
 0x170   :  { %281 = shalt.err (!%p278_p12)
}
 0x171   :  { %s282_s30 = scalar_lea.hbm %s355_s2, 256 }
 0x172   :  { %p283_p13 = scmp.ne.s32.totalorder %s355_s2, %s282_s30  ;;  %p286_p0 = scmp.lt.u32.totalorder %s282_s30, %s355_s2 }
 0x174   :  { %p288_p1 = pnand %p286_p0, %p283_p13 }
 0x176   :  { %291 = shalt.err (!%p288_p1)
}
 0x177   :  { %146 = dma.vmem_to_hbm [thread:$0]  %s141_s1, 256, %s355_s2, [#allocation4], %s297_s19, %s297_s19, %s298_s20  }
 0x178   :  { %294 = dma.done.wait [#allocation4], 256  }
 0x179   :  { %295 = vsyncadd [#allocation4], 4294967040 }
 0x17a   :  { %150 = vsyncpa [#allocation3], 1 }
 0x17b   :  { %151 = vsyncpa [#allocation4], 1 }

</bundles_post_ra>
